<compile_context>
chip_gen: v5e
topology: v5e:2x2
jax: 0.10.0
libtpu: 0.0.40
codegen_flags: <defaults>
</compile_context>

<pallas_src>
import math

import jax
import jax.numpy as jnp
from jax.experimental import pallas as pl
from jax.experimental.pallas import tpu as pltpu

_LANE = 128      # TPU lane width (last dim)
_SUBLANE = 8     # f32 sublane packing (second-to-last dim)


def _round_up(x, m):
    return (x + m - 1) // m * m


def _pad_feature_dim(d):
    # Pad to 128 for small features, otherwise to 256 (v6e/v7x MXU is 2x256^2).
    return _round_up(d, _LANE) if d <= _LANE else _round_up(d, 2 * _LANE)


def _vmem_cap_bytes():
    try:
        return int(pltpu.get_tpu_info().vmem_capacity_bytes)
    except Exception:
        return 64 << 20  # conservative fallback (v7x per-TensorCore VMEM)


def _gru_step_kernel(hx_ref, h_ref, x_ref, w_ref, o_ref):
    """One (hidden-tile, batch-tile) grid step.

    hx_ref : [block_b, Kp]      matmul dtype (bf16 by default), Kp = 2*hp
    h_ref  : [block_b, block_n] f32  (this hidden tile of h, for the blend)
    x_ref  : [block_b, block_n] f32  (this hidden tile of x, for the blend)
    w_ref  : [Kp, block_n]      matmul dtype ([Wh ; Wx] stacked along K)
    o_ref  : [block_b, block_n]
    """
    # z = sigmoid([h, x] @ W^T); one MXU push, f32 accumulation.
    logits = jnp.dot(hx_ref[...], w_ref[...], preferred_element_type=jnp.float32)
    z = jax.nn.sigmoid(logits)          # f32 on the EUP
    # Gated residual blend, f32 on the VPU, lane-dense store.
    o_ref[...] = ((1.0 - z) * h_ref[...] + z * x_ref[...]).astype(o_ref.dtype)


def prepare_gru_weights(weight, input_size, hidden_size, *, matmul_dtype=jnp.bfloat16):
    """Split + transpose + pad + stack + cast the nn.Linear weight ONCE.

    weight: [hidden, hidden + input]  (PyTorch nn.Linear layout [out, in])
    Returns W of shape [hp + ip, hp] (K, N layout):
        rows 0..hp-1   = W[:, :hidden]^T   (Wh, zero padded)
        rows hp..Kp-1  = W[:, hidden:]^T   (Wx, zero padded)
    stored in matmul_dtype (bf16 default -> halves weight HBM traffic and runs
    the MXU at native bf16 rate; pass jnp.float32 for the exact path).
    """
    assert weight.shape == (hidden_size, hidden_size + input_size)
    hp = _pad_feature_dim(hidden_size)
    ip = _pad_feature_dim(input_size)
    wh = jnp.transpose(weight[:, :hidden_size])   # [H, H]  (K, N)
    wx = jnp.transpose(weight[:, hidden_size:])   # [I, H]  (K, N)
    wh = jnp.pad(wh, ((0, hp - hidden_size), (0, hp - hidden_size)))
    wx = jnp.pad(wx, ((0, ip - input_size), (0, hp - hidden_size)))
    w = jnp.concatenate([wh, wx], axis=0)         # [Kp, hp]
    return w.astype(matmul_dtype)


def gru_step(inp, h_state, w, *, block_b_max=512, block_n_max=1024):
    """
    inp:     [B, input_size]   float32
    h_state: [B, hidden_size]  float32
    w:       pre-stacked/transposed/padded weight from prepare_gru_weights()
    returns  [B, hidden_size]
    """
    B, hidden_size = h_state.shape
    input_size = inp.shape[-1]
    assert input_size == hidden_size, (
        "GRUStep blend (1-z)*h + z*x requires input_size == hidden_size")

    Kp, hp = w.shape
    assert Kp == 2 * hp, "weight must come from prepare_gru_weights()"
    matmul_dtype = w.dtype
    act_bytes = jnp.dtype(matmul_dtype).itemsize

    # ---- generation-aware tile sizing --------------------------------------
    vmem_cap = _vmem_cap_bytes()
    budget = int(0.7 * vmem_cap)   # per-core; megacore does NOT relieve per-core VMEM

    def footprint(bb, bn):
        # Double-buffered: hx + weight tile (matmul dtype) + h/x/out tiles (f32).
        return 2 * (bb * Kp * act_bytes + Kp * bn * act_bytes + 3 * bb * bn * 4)

    block_n = hp
    for cand in (block_n_max, 512, 256, _LANE):
        if cand <= hp and hp % cand == 0:
            block_n = cand
            break

    block_b = min(_round_up(B, _SUBLANE), block_b_max)

    # Shrink tiles (N first, then B) to fit the per-core VMEM budget.
    while (footprint(block_b, block_n) > budget and block_n > _LANE
           and hp % (block_n // 2) == 0):
        block_n //= 2
    while footprint(block_b, block_n) > budget and block_b > _SUBLANE:
        block_b = max(_SUBLANE, _round_up(block_b // 2, _SUBLANE))

    bp = _round_up(B, block_b)
    n_b = bp // block_b
    n_n = hp // block_n

    # Give v7x's second TensorCore something to do when everything fits one tile.
    if n_b == 1 and n_n == 1 and bp >= 2 * _SUBLANE:
        block_b = _round_up(pl.cdiv(bp, 2), _SUBLANE)
        bp = _round_up(B, block_b)
        n_b = bp // block_b

    # ---- pad activations.  Zero padding is exact: padded weight rows add 0 to
    # the logits; padded weight columns give logits==0 -> z=0.5, blended with
    # zero-padded h/x -> 0; padded rows/cols are sliced off below. ------------
    h_p = jnp.pad(h_state.astype(jnp.float32),
                  ((0, bp - B), (0, hp - hidden_size)))
    x_p = jnp.pad(inp.astype(jnp.float32),
                  ((0, bp - B), (0, hp - input_size)))
    # Matmul operand [h | x], pre-cast ONCE in the wrapper (no in-kernel casts).
    hx = jnp.concatenate([h_p, x_p], axis=-1).astype(matmul_dtype)   # [bp, Kp]

    cost = pl.CostEstimate(
        flops=2 * bp * hp * Kp + 5 * bp * hp,
        transcendentals=bp * hp,
        bytes_accessed=(bp * Kp * act_bytes + Kp * hp * act_bytes
                        + 3 * bp * hp * 4),
    )

    fp = footprint(block_b, block_n)
    vmem_limit = int(min(vmem_cap, max(fp + (8 << 20), 32 << 20)))

    # Grid order: hidden tiles OUTER, batch tiles INNER.  The weight block
    # index depends only on the outer axis, so the pipeliner keeps Wh/Wx
    # resident across the whole inner batch loop (one weight DMA per N tile).
    out_p = pl.pallas_call(
        _gru_step_kernel,
        out_shape=jax.ShapeDtypeStruct((bp, hp), jnp.float32),
        grid=(n_n, n_b),
        in_specs=[
            pl.BlockSpec((block_b, Kp),      lambda j, i: (i, 0)),  # hx (full K)
            pl.BlockSpec((block_b, block_n), lambda j, i: (i, j)),  # h  (blend tile)
            pl.BlockSpec((block_b, block_n), lambda j, i: (i, j)),  # x  (blend tile)
            pl.BlockSpec((Kp, block_n),      lambda j, i: (0, j)),  # W  (inner-invariant)
        ],
        out_specs=pl.BlockSpec((block_b, block_n), lambda j, i: (i, j)),
        input_output_aliases={1: 0},   # in-place h_state update (safe: blend reads
                                       # only its own (i, j) tile; matmul uses hx)
        cost_estimate=cost,
        compiler_params=pltpu.CompilerParams(
            dimension_semantics=("parallel", "parallel"),
            vmem_limit_bytes=vmem_limit,
        ),
    )(hx, h_p, x_p, w)

    return out_p[:B, :hidden_size].astype(h_state.dtype)

# TODO(synk): if this cell runs inside a timestep scan, fuse the loop into the
# kernel (grid over T, weight with a constant index_map, h carried in VMEM
# scratch) so W is DMA'd from HBM once per sequence instead of once per step.


def gru_step_ref(inp, h_state, weight):
    z = jax.nn.sigmoid(jnp.concatenate([h_state, inp], axis=-1) @ weight.T)
    return (1.0 - z) * h_state + z * inp


if __name__ == "__main__":
    B = 8
    input_size = 32
    hidden_size = 32  # elementwise blend requires input_size == hidden_size

    key = jax.random.PRNGKey(0)
    kx, kh, kw = jax.random.split(key, 3)

    x = jax.random.normal(kx, (B, input_size), dtype=jnp.float32)
    h = jax.random.normal(kh, (B, hidden_size), dtype=jnp.float32)

    # Deterministic init matching nn.Linear's default U(-1/sqrt(fan_in), ...).
    fan_in = hidden_size + input_size
    bound = 1.0 / math.sqrt(fan_in)
    weight = jax.random.uniform(
        kw, (hidden_size, fan_in), minval=-bound, maxval=bound, dtype=jnp.float32
    )

    ref = gru_step_ref(x, h, weight)

    # Default fast path: bf16 weights + bf16 MXU, f32 accumulate / gate math.
    w_bf16 = jax.block_until_ready(
        prepare_gru_weights(weight, input_size, hidden_size))
    out = jax.block_until_ready(gru_step(x, h, w_bf16))
    assert out.shape == (B, hidden_size)
    assert jnp.allclose(out, ref, atol=1e-2, rtol=1e-2), "bf16 path mismatch vs reference"

    # Exact f32 path sanity check.
    w_f32 = jax.block_until_ready(
        prepare_gru_weights(weight, input_size, hidden_size, matmul_dtype=jnp.float32))
    out32 = jax.block_until_ready(gru_step(x, h, w_f32))
    assert jnp.allclose(out32, ref, atol=1e-5, rtol=1e-5), "f32 path mismatch vs reference"

    print("KERNEL_OK")
</pallas_src>

<mosaic_0001>
module attributes {stable_mosaic.version = 11 : i64} {
  func.func @_gru_step_kernel(%arg0: i32, %arg1: i32, %arg2: memref<8x256xbf16, #tpu.memory_space<vmem>>, %arg3: memref<8x128xf32, #tpu.memory_space<vmem>>, %arg4: memref<8x128xf32, #tpu.memory_space<vmem>>, %arg5: memref<256x128xbf16, #tpu.memory_space<vmem>>, %arg6: memref<8x128xf32, #tpu.memory_space<vmem>>) attributes {dimension_semantics = [#tpu.dimension_semantics<parallel>, #tpu.dimension_semantics<parallel>], iteration_bounds = array<i64: 1, 1>, scalar_prefetch = 0 : i64, scratch_operands = 0 : i64, tpu.core_type = #tpu.core_type<tc>, window_params = [{transform_indices = @transform_0, window_bounds = array<i64: 8, 256>}, {transform_indices = @transform_1, window_bounds = array<i64: 8, 128>}, {transform_indices = @transform_2, window_bounds = array<i64: 8, 128>}, {transform_indices = @transform_3, window_bounds = array<i64: 256, 128>}, {transform_indices = @transform_4, window_bounds = array<i64: 8, 128>}]} {
    %c0 = arith.constant 0 : index
    %c0_0 = arith.constant 0 : index
    %0 = vector.load %arg2[%c0, %c0_0] : memref<8x256xbf16, #tpu.memory_space<vmem>>, vector<8x256xbf16>
    %c0_1 = arith.constant 0 : index
    %c0_2 = arith.constant 0 : index
    %1 = vector.load %arg5[%c0_1, %c0_2] : memref<256x128xbf16, #tpu.memory_space<vmem>>, vector<256x128xbf16>
    %cst = arith.constant dense<0.000000e+00> : vector<8x128xf32>
    %2 = tpu.matmul %0, %1, %cst {dimension_numbers = #tpu.dot_dimension_numbers<[1], [0], [0], [1], [0, 0, 1, 1], [], []>} : vector<8x256xbf16>, vector<256x128xbf16>, vector<8x128xf32> -> vector<8x128xf32>
    %3 = arith.negf %2 : vector<8x128xf32>
    %4 = math.exp %3 : vector<8x128xf32>
    %cst_3 = arith.constant 1.000000e+00 : f32
    %5 = vector.broadcast %cst_3 : f32 to vector<8x128xf32>
    %6 = arith.addf %5, %4 : vector<8x128xf32>
    %7 = arith.divf %5, %6 : vector<8x128xf32>
    %cst_4 = arith.constant 1.000000e+00 : f32
    %8 = vector.broadcast %cst_4 : f32 to vector<8x128xf32>
    %9 = arith.subf %8, %7 : vector<8x128xf32>
    %c0_5 = arith.constant 0 : index
    %c0_6 = arith.constant 0 : index
    %10 = vector.load %arg3[%c0_5, %c0_6] : memref<8x128xf32, #tpu.memory_space<vmem>>, vector<8x128xf32>
    %11 = arith.mulf %9, %10 : vector<8x128xf32>
    %c0_7 = arith.constant 0 : index
    %c0_8 = arith.constant 0 : index
    %12 = vector.load %arg4[%c0_7, %c0_8] : memref<8x128xf32, #tpu.memory_space<vmem>>, vector<8x128xf32>
    %13 = arith.mulf %7, %12 : vector<8x128xf32>
    %14 = arith.addf %11, %13 : vector<8x128xf32>
    %c0_9 = arith.constant 0 : index
    %c0_10 = arith.constant 0 : index
    %15 = vector.load %arg6[%c0_9, %c0_10] : memref<8x128xf32, #tpu.memory_space<vmem>>, vector<8x128xf32>
    tpu.vector_store %arg6[%c0_9, %c0_10], %14 {strides = array<i32>} : memref<8x128xf32, #tpu.memory_space<vmem>>, vector<8x128xf32>,
    return
  }
  func.func @transform_0(%arg0: i32, %arg1: i32) -> (i32, i32) {
    %c0_i32 = arith.constant 0 : i32
    %c0_i32_0 = arith.constant 0 : i32
    return %arg1, %c0_i32 : i32, i32
  }
  func.func @transform_1(%arg0: i32, %arg1: i32) -> (i32, i32) {
    %c0_i32 = arith.constant 0 : i32
    return %arg1, %arg0 : i32, i32
  }
  func.func @transform_2(%arg0: i32, %arg1: i32) -> (i32, i32) {
    %c0_i32 = arith.constant 0 : i32
    return %arg1, %arg0 : i32, i32
  }
  func.func @transform_3(%arg0: i32, %arg1: i32) -> (i32, i32) {
    %c0_i32 = arith.constant 0 : i32
    %c0_i32_0 = arith.constant 0 : i32
    return %c0_i32, %arg0 : i32, i32
  }
  func.func @transform_4(%arg0: i32, %arg1: i32) -> (i32, i32) {
    %c0_i32 = arith.constant 0 : i32
    return %arg1, %arg0 : i32, i32
  }
}

</mosaic_0001>

<bundles_post_ra>
// kernel: tpu_custom_call.1
= control target key start
LH: loop header
LB: loop body
LE: loop exit
PB: predicated region body
PF: predicated region fallthrough
CT: control target
= control target key end

     0   :  { %9 = vsyncpa [#allocation3], 0  ;;  %s467_s0 = inlined_call_operand.vmem [shape: bf16[8,256], index: 0, kind: input, shape index: {}]   ;;  %s468_s1 = inlined_call_operand.hbm [shape: f32[8,128], index: 1, kind: input, shape index: {}, may-alias: {1,4}]   ;;  %s469_s2 = inlined_call_operand.vmem [shape: f32[8,128], index: 2, kind: input, shape index: {}]   ;;  %s470_s3 = inlined_call_operand.hbm [shape: bf16[256,128], index: 3, kind: input, shape index: {}]   ;;  %s471_s4 = inlined_call_operand.hbm [shape: f32[8,128], index: 4, kind: output, shape index: {}, may-alias: {1,4}]  }
   0x1   :  { %10 = vsyncpa [#allocation6], 0 }
   0x2   :  { %11 = vsyncpa [#allocation4], 0  ;;  %s19_s17 = sshll.u32 %s468_s1, 4  ;;  %s422_s18 = smov [#allocation2]   ;;  %s20_s17 = int_to_ptr.hbm [resolvable:$true] %s19_s17 }
   0x3   :  { %s21_s19 = sshll.u32 %s422_s18, 4  ;;  %s31_s22 = sshll.u32 %s470_s3, 4  ;;  %s22_s19 = int_to_ptr.vmem [resolvable:$true] %s21_s19  ;;  %s32_s22 = int_to_ptr.hbm [resolvable:$true] %s31_s22 }
   0x4   :  { %24 = dma.hbm_to_vmem [thread:$0]  %s20_s17, 128, %s22_s19, [#allocation3]  }
   0x5   :  { %s423_s23 = smov [#allocation5]   ;;  %s424_s25 = smov 64  }
   0x6   :  { %s33_s24 = sshll.u32 %s423_s23, 4  ;;  %s425_s26 = smov 4   ;;  %s34_s24 = int_to_ptr.vmem [resolvable:$true] %s33_s24 }
   0x7   :  { %39 = dma.hbm_to_vmem [thread:$0]  %s32_s22, 2048, %s34_s24, [#allocation6], %s424_s25, %s424_s25, %s425_s26  }
   0x8   :  { %416 = dma.done.wait [#allocation3], 128  }
   0x9   :  { %417 = vsyncadd [#allocation3], 4294967168 }
   0xa   :  { %418 = dma.done.wait [#allocation6], 2048  }
   0xb   :  { %419 = vsyncadd [#allocation6], 4294965248  ;;  %v326_v0 = vld [vmem:[#allocation5 + $0x38] sm:$0xff]  ;;  %v325_v2 = vld [vmem:[#allocation5 + $0x30] sm:$0xff]  ;;  %s426_s28 = smov [#allocation7]   ;;  %s243_s6 = sshll.u32 %s471_s4, 4  ;;  %s244_s6 = int_to_ptr.hbm [resolvable:$true] %s243_s6 }
   0xc   :  { %v334_v1 = vld [vmem:[#allocation5 + $0x78] sm:$0xff]  ;;  %184 = vmatpush.bf16.msra.mxu0 %v326_v0  ;;  %v333_v3 = vld [vmem:[#allocation5 + $0x70] sm:$0xff]  ;;  %v324_v4 = vld [vmem:[#allocation5 + $0x28] sm:$0xff]  ;;  %s241_s29 = sshll.u32 %s426_s28, 4  ;;  %s242_s29 = int_to_ptr.vmem [resolvable:$true] %s241_s29 }
   0xd   :  { %197 = vmatpush.bf16.msra.mxu1 %v334_v1  ;;  %v332_v5 = vld [vmem:[#allocation5 + $0x68] sm:$0xff]  ;;  %v323_v6 = vld [vmem:[#allocation5 + $0x20] sm:$0xff]  ;;  %v322_v8 = vld [vmem:[#allocation5 + $0x18] sm:$0xff] }
   0xe   :  { %v331_v7 = vld [vmem:[#allocation5 + $0x60] sm:$0xff]  ;;  %v330_v9 = vld [vmem:[#allocation5 + $0x58] sm:$0xff]  ;;  %v321_v10 = vld [vmem:[#allocation5 + $0x10] sm:$0xff] }
   0xf   :  { %v329_v11 = vld [vmem:[#allocation5 + $0x50] sm:$0xff]  ;;  %v320_v12 = vld [vmem:[#allocation5 + $0x8] sm:$0xff]  ;;  %v48_v14 = vld [vmem:[%s467_s0] sm:$0xff] }
  0x10   :  { %185 = vmatpush.bf16.msra.mxu0 %v325_v2  ;;  %v328_v13 = vld [vmem:[#allocation5 + $0x48] sm:$0xff]  ;;  %v82_v15 = vunpack.c.l.b16 %v48_v14  ;;  %v83_v16 = vunpack.c.h.b16 %v48_v14  ;;  %v319_v17 = vld [vmem:[#allocation5] sm:$0xff]  ;;  %v230_v39 = vld [vmem:[#allocation2] sm:$0xff] }
  0x11   :  { %198 = vmatpush.bf16.msra.mxu1 %v333_v3  ;;  %v327_v18 = vld [vmem:[#allocation5 + $0x40] sm:$0xff]  ;;  %v232_v40 = vld [vmem:[%s469_s2] sm:$0xff] }
  0x12   :  { %v84_v19 = vpack.c.b16 %v82_v15, %v82_v15  ;;  %v85_v20 = vpack.c.b16 %v83_v16, %v83_v16 }
  0x14   :  { %186 = vmatpush.bf16.msra.mxu0 %v324_v4 }
  0x15   :  { %199 = vmatpush.bf16.msra.mxu1 %v332_v5 }
  0x18   :  { %187 = vmatpush.bf16.msra.mxu0 %v323_v6 }
  0x19   :  { %200 = vmatpush.bf16.msra.mxu1 %v331_v7 }
  0x1c   :  { %188 = vmatpush.bf16.msra.mxu0 %v322_v8 }
  0x1d   :  { %201 = vmatpush.bf16.msra.mxu1 %v330_v9 }
  0x20   :  { %189 = vmatpush.bf16.msra.mxu0 %v321_v10 }
  0x21   :  { %202 = vmatpush.bf16.msra.mxu1 %v329_v11 }
  0x24   :  { %190 = vmatpush.bf16.msra.mxu0 %v320_v12 }
  0x25   :  { %203 = vmatpush.bf16.msra.mxu1 %v328_v13 }
  0x28   :  { %191 = vmatpush.bf16.msra.mxu0 %v319_v17 }
  0x29   :  { %204 = vmatpush.bf16.msra.mxu1 %v327_v18 }
  0x2b   :  { %192 = vmatmul.bf16.vlgmr.msra.gmra.mxu0 %v84_v19 }
  0x2c   :  { %205 = vmatmul.bf16.vlgmr.msra.gmra.mxu1 %v85_v20 }
  0xa8   :  { %v193_v21 = vpop.f32.mrf.mxu0 }
  0xa9   :  { %v206_v22 = vpop.f32.mrf.mxu1 }
  0xaa   :  { %v207_v23 = vadd.f32 %v206_v22, %v193_v21 }
  0xac   :  { %v318_v24 = vmul.f32 -1.442695, %v207_v23 }
  0xae   :  { %340 = vpow2.f32 %v318_v24 }
  0xb0   :  { %v195_v25 = vpop.f32.mrf.mxu0 }
  0xb1   :  { %v208_v26 = vpop.f32.mrf.mxu1 }
  0xb4   :  { %v341_v27 = vpop.eup %340 }
  0xb5   :  { %v213_v28 = vadd.f32 1.0, %v341_v27 }
  0xb7   :  { %342 = vrcp.f32 %v213_v28  ;;  %v225_v32 = vand.u32 2147483648, %v213_v28  ;;  %v223_v34 = vand.u32 2147483647, %v213_v28  ;;  %vm219_vm1 = vweird.f32 %v213_v28 }
  0xb9   :  { %v226_v36 = vor.u32 1.1754944e-38, %v225_v32  ;;  %vm224_vm3 = vcmp.eq.f32.partialorder %v223_v34, 8.507059e+37 }
  0xbd   :  { %v343_v29 = vpop.eup %342 }
  0xbe   :  { %v215_v30 = vmul.f32 %v343_v29, %v213_v28  ;;  %vm220_vm0 = vweird.f32 %v343_v29 }
  0xbf   :  { %vm221_vm2 = vmor %vm219_vm1, %vm220_vm0 }
  0xc0   :  { %v216_v31 = vsub.f32 1.0, %v215_v30 }
  0xc2   :  { %v217_v33 = vmul.f32 %v343_v29, %v216_v31 }
  0xc4   :  { %v218_v35 = vadd.f32 %v343_v29, %v217_v33 }
  0xc6   :  { %v222_v37 = vsel %vm221_vm2, %v343_v29, %v218_v35 }
  0xc7   :  { %v227_v38 = vsel %vm224_vm3, %v226_v36, %v222_v37 }
  0xc8   :  { %v229_v41 = vsub.f32 1.0, %v227_v38  ;;  %v233_v43 = vmul.f32 %v232_v40, %v227_v38 }
  0xca   :  { %v231_v42 = vmul.f32 %v230_v39, %v229_v41 }
  0xcc   :  { %v234_v44 = vadd.f32 %v233_v43, %v231_v42 }
  0xce   :  { %235 = vst [vmem:[#allocation7] sm:$0xff] %v234_v44 }
  0xcf   :  { %246 = dma.vmem_to_hbm [thread:$0]  %s242_s29, 128, %s244_s6, [#allocation4]  }
  0xd0   :  { %420 = dma.done.wait [#allocation4], 128  }
  0xd1   :  { %421 = vsyncadd [#allocation4], 4294967168 }
  0xd2   :  { %251 = vsyncpa [#allocation3], 1 }
  0xd3   :  { %252 = vsyncpa [#allocation6], 1 }
  0xd4   :  { %253 = vsyncpa [#allocation4], 1 }

</bundles_post_ra>
